<compile_context>
chip_gen: v5e
topology: v5e:2x2
jax: 0.10.0
libtpu: 0.0.40
codegen_flags: <defaults>
</compile_context>

<pallas_src>
import jax
import jax.numpy as jnp
from jax.experimental import pallas as pl
from jax.experimental.pallas import tpu as pltpu

# ----------------------------- configuration --------------------------------
C_IN = 4          # latent channels (UNet in_channels)
C_OUT = 4         # predicted noise channels
C_HID = 32        # base UNet channels
T_SIN = 32        # sinusoidal embedding dim
T_EMB = 128       # time embedding dim
NUM_GROUPS = 8
N_RESBLOCKS = 2
EPS = 1e-5


# --------------------- pltpu.roll direction probe ----------------------------
def _probe_roll_direction():
    """Return True if pltpu.roll matches jnp.roll (element i -> i + shift)."""
    def k(x_ref, o_ref):
        o_ref[...] = pltpu.roll(x_ref[...], 1, axis=1)

    x = jax.lax.broadcasted_iota(jnp.float32, (8, 128), 1)
    y = pl.pallas_call(k, out_shape=jax.ShapeDtypeStruct((8, 128), jnp.float32))(x)
    return float(y[0, 0]) == 127.0


# ------------------------------ fused UNet kernel -----------------------------
def _build_unet_kernel(H, W, NB, roll_matches_jnp):
    """Fused UNet forward.  Activations live as (C, L) with L = NB * H * W."""
    HW = H * W
    L = NB * HW
    GS = C_HID // NUM_GROUPS

    def shift_for(offset):
        # want y[:, p] = x[:, p + offset]  (out-of-image taps masked to zero)
        return (-offset) % L if roll_matches_jnp else offset % L

    TAPS = [(dh, dw) for dh in (-1, 0, 1) for dw in (-1, 0, 1)]
    SHIFTS = [shift_for(dh * W + dw) for dh, dw in TAPS]
    # row index into the packed mask for each tap (None for the center tap)
    MASK_ROW, r = [], 0
    for dh, dw in TAPS:
        if dh == 0 and dw == 0:
            MASK_ROW.append(None)
        else:
            MASK_ROW.append(r)
            r += 1

    def kernel(x_ref, tembs_ref, ciw_ref, cib_ref,
               g1g_ref, g1b_ref, c1w_ref, c1b_ref,
               g2g_ref, g2b_ref, c2w_ref, c2b_ref,
               gog_ref, gob_ref, cow_ref, cob_ref,
               o_ref):
        # ---- grid-invariant constants (grid is 1-2 steps -> built once/twice) ----
        idx = jax.lax.broadcasted_iota(jnp.int32, (1, L), 1)
        pos = idx % HW                       # per-image pixel index (batch folded)
        hh = pos // W
        ww = pos - hh * W

        # packed multiplicative boundary masks: ONE (8, L) bf16 array (~2 vregs),
        # sliced per tap (instead of 8 live (1, L) f32 masks).
        mrows = []
        for dh, dw in TAPS:
            if dh == 0 and dw == 0:
                continue
            ok = ((hh + dh >= 0) & (hh + dh < H) &
                  (ww + dw >= 0) & (ww + dw < W))
            mrows.append(ok.astype(jnp.bfloat16))
        mpack = jnp.concatenate(mrows, axis=0)          # (8, L) bf16 of {0, 1}

        # group-average pooling matrix, built in-kernel (no extra operand DMA)
        ri = jax.lax.broadcasted_iota(jnp.int32, (C_HID, C_HID), 0)
        ci = jax.lax.broadcasted_iota(jnp.int32, (C_HID, C_HID), 1)
        a_avg = jnp.where((ri // GS) == (ci // GS),
                          1.0 / (HW * GS), 0.0).astype(jnp.float32)

        def conv3x3(xt, w2d, bias):
            # xt: (Cin, L) f32; w2d: (Cout, 9*Cin) bf16; bias: (Cout, 1) f32
            xb = xt.astype(jnp.bfloat16)                # single cast per conv
            taps = []
            for t in range(9):
                v = xb if SHIFTS[t] == 0 else pltpu.roll(xb, SHIFTS[t], axis=1)
                row = MASK_ROW[t]
                if row is not None:
                    v = v * mpack[row:row + 1, :]       # mask applied once per tap
                taps.append(v)
            xs = jnp.concatenate(taps, axis=0)          # (9*Cin, L) bf16, K-stacked
            return jnp.dot(w2d, xs, preferred_element_type=jnp.float32) + bias

        def gn_silu(ht, gamma, beta):
            # per-image GroupNorm: stats over aligned lane slices, ONE pooling dot
            if NB == 1:
                subs = [ht]
            else:
                subs = [ht[:, b * HW:(b + 1) * HW] for b in range(NB)]
            stats = []
            for hb in subs:
                stats.append(jnp.sum(hb, axis=1, keepdims=True))        # (C, 1)
                stats.append(jnp.sum(hb * hb, axis=1, keepdims=True))   # (C, 1)
            pooled = jnp.dot(a_avg, jnp.concatenate(stats, axis=1),
                             preferred_element_type=jnp.float32)        # (C, 2*NB)
            parts = []
            for b, hb in enumerate(subs):
                mean = pooled[:, 2 * b:2 * b + 1]
                ex2 = pooled[:, 2 * b + 1:2 * b + 2]
                var = jnp.maximum(ex2 - mean * mean, 0.0)                # clamp: no NaN
                inv = jax.lax.rsqrt(var + EPS)
                sc = inv * gamma                                         # (C, 1)
                of = beta - mean * sc                                    # (C, 1)
                y = hb * sc + of
                parts.append(y * jax.nn.sigmoid(y))                      # SiLU
            return parts[0] if NB == 1 else jnp.concatenate(parts, axis=1)

        xt = x_ref[0].astype(jnp.float32)                                # (C_IN, L)
        h = conv3x3(xt, ciw_ref[...], cib_ref[...])

        for b in range(N_RESBLOCKS):
            skip = h
            g1 = gn_silu(h, g1g_ref[b], g1b_ref[b])
            h1 = conv3x3(g1, c1w_ref[b], c1b_ref[b]) + tembs_ref[0, b]   # (C, L) add
            g2 = gn_silu(h1, g2g_ref[b], g2b_ref[b])
            h = conv3x3(g2, c2w_ref[b], c2b_ref[b]) + skip

        go = gn_silu(h, gog_ref[...], gob_ref[...])
        out = conv3x3(go, cow_ref[...], cob_ref[...])
        o_ref[0] = out.astype(o_ref.dtype)                               # (C_OUT, L)

    return kernel


# ----------------------------------- glue ------------------------------------
def sinusoidal_embedding(timesteps, dim):
    half = dim // 2
    freqs = jnp.exp(-jnp.log(10000.0) * jnp.arange(half, dtype=jnp.float32) / half)
    args = timesteps.astype(jnp.float32)[:, None] * freqs[None, :]
    return jnp.concatenate([jnp.sin(args), jnp.cos(args)], axis=-1)


def init_params(key):
    ks = iter(jax.random.split(key, 32))
    nrm = lambda k, shape, s=0.05: s * jax.random.normal(k, shape, dtype=jnp.float32)
    bf = jnp.bfloat16
    return {
        # time MLP (tiny M=N matmuls: left to XLA)
        "time_w1": nrm(next(ks), (T_SIN, T_EMB)),
        "time_b1": jnp.zeros((T_EMB,), jnp.float32),
        "time_w2": nrm(next(ks), (T_EMB, T_EMB)),
        "time_b2": jnp.zeros((T_EMB,), jnp.float32),
        "rb_temb_w": nrm(next(ks), (N_RESBLOCKS, T_EMB, C_HID)),
        "rb_temb_b": jnp.zeros((N_RESBLOCKS, C_HID), jnp.float32),
        # conv weights in tap-major layout (9, Cout, Cin), bf16 storage
        "conv_in_w": nrm(next(ks), (9, C_HID, C_IN)).astype(bf),
        "conv_in_b": jnp.zeros((C_HID, 1), jnp.float32),
        "rb_gn1_g": jnp.ones((N_RESBLOCKS, C_HID, 1), jnp.float32),
        "rb_gn1_b": jnp.zeros((N_RESBLOCKS, C_HID, 1), jnp.float32),
        "rb_conv1_w": nrm(next(ks), (N_RESBLOCKS, 9, C_HID, C_HID)).astype(bf),
        "rb_conv1_b": jnp.zeros((N_RESBLOCKS, C_HID, 1), jnp.float32),
        "rb_gn2_g": jnp.ones((N_RESBLOCKS, C_HID, 1), jnp.float32),
        "rb_gn2_b": jnp.zeros((N_RESBLOCKS, C_HID, 1), jnp.float32),
        "rb_conv2_w": nrm(next(ks), (N_RESBLOCKS, 9, C_HID, C_HID)).astype(bf),
        "rb_conv2_b": jnp.zeros((N_RESBLOCKS, C_HID, 1), jnp.float32),
        "gn_out_g": jnp.ones((C_HID, 1), jnp.float32),
        "gn_out_b": jnp.zeros((C_HID, 1), jnp.float32),
        "conv_out_w": nrm(next(ks), (9, C_OUT, C_HID)).astype(bf),
        "conv_out_b": jnp.zeros((C_OUT, 1), jnp.float32),
    }


def lem_forward(params, noisy_latents, timesteps, *, roll_matches_jnp=True,
                batches_per_step=None):
    """LEM.forward: noise_pred = unet(noisy_latents, timesteps).sample (NCHW in/out).

    batches_per_step: how many batch images are folded into the lane axis of a
    single grid step.  Default (None) folds the whole batch -> grid of 1 step
    (best for single-TC v5e/v6e).  On v7x pass N//2 to keep 2 parallel steps.
    """
    N, Cin, H, W = noisy_latents.shape
    HW = H * W
    NB = N if batches_per_step is None else batches_per_step
    assert N % NB == 0, "batch must be divisible by batches_per_step"
    steps = N // NB
    L = NB * HW

    # fold batch into lanes: (steps, C, NB*HW), lane block b = image (step*NB + b)
    x = (noisy_latents.reshape(steps, NB, Cin, HW)
         .transpose(0, 2, 1, 3).reshape(steps, Cin, L))

    # time embedding: sinusoidal -> Linear -> SiLU -> Linear -> SiLU, then the
    # per-block projections.  Tiny (M=N) matmuls: left to XLA.
    temb = sinusoidal_embedding(timesteps, T_SIN)
    temb = jax.nn.silu(temb @ params["time_w1"] + params["time_b1"])
    temb = temb @ params["time_w2"] + params["time_b2"]
    temb_act = jax.nn.silu(temb)
    tembs = jnp.stack(
        [temb_act @ params["rb_temb_w"][b] + params["rb_temb_b"][b]
         for b in range(N_RESBLOCKS)], axis=1)                       # (N, NRES, C)
    # spread to lanes, matching the batch-folded activation layout
    tembs = (tembs.reshape(steps, NB, N_RESBLOCKS, C_HID)
             .transpose(0, 2, 3, 1))                                 # (steps, NRES, C, NB)
    tembs = jnp.repeat(tembs, HW, axis=-1)                           # (steps, NRES, C, L)

    # conv weights reshaped to K-stacked (Cout, 9*Cin) layout (bf16)
    ciw = jnp.transpose(params["conv_in_w"], (1, 0, 2)).reshape(C_HID, 9 * C_IN)
    c1w = jnp.transpose(params["rb_conv1_w"], (0, 2, 1, 3)).reshape(
        N_RESBLOCKS, C_HID, 9 * C_HID)
    c2w = jnp.transpose(params["rb_conv2_w"], (0, 2, 1, 3)).reshape(
        N_RESBLOCKS, C_HID, 9 * C_HID)
    cow = jnp.transpose(params["conv_out_w"], (1, 0, 2)).reshape(C_OUT, 9 * C_HID)

    kernel = _build_unet_kernel(H, W, NB, roll_matches_jnp)

    def full(a):
        nd = a.ndim
        return pl.BlockSpec(a.shape, lambda n, _nd=nd: (0,) * _nd)

    weights = [
        ciw, params["conv_in_b"],
        params["rb_gn1_g"], params["rb_gn1_b"], c1w, params["rb_conv1_b"],
        params["rb_gn2_g"], params["rb_gn2_b"], c2w, params["rb_conv2_b"],
        params["gn_out_g"], params["gn_out_b"], cow, params["conv_out_b"],
    ]
    in_specs = [
        pl.BlockSpec((1, Cin, L), lambda n: (n, 0, 0)),
        pl.BlockSpec((1, N_RESBLOCKS, C_HID, L), lambda n: (n, 0, 0, 0)),
    ] + [full(w) for w in weights]

    out = pl.pallas_call(
        kernel,
        out_shape=jax.ShapeDtypeStruct((steps, C_OUT, L), jnp.float32),
        grid=(steps,),
        in_specs=in_specs,
        out_specs=pl.BlockSpec((1, C_OUT, L), lambda n: (n, 0, 0)),
        compiler_params=pltpu.CompilerParams(dimension_semantics=("parallel",)),
    )(x, tembs, *weights)

    # unfold lanes back to NCHW
    out = (out.reshape(steps, C_OUT, NB, HW)
           .transpose(0, 2, 1, 3).reshape(N, C_OUT, H, W))
    return out

# TODO(synk): LEM.load_from_checkpoint (torch.load of image_proj / ip_adapter
# weights) has no Pallas equivalent; weights are initialized in-script instead.


# ------------------------ pure-JAX reference (for checking) -------------------
def _conv3x3_ref(x, w9, b):
    N, Cin, H, W = x.shape
    xp = jnp.pad(x, ((0, 0), (0, 0), (1, 1), (1, 1)))
    out = 0.0
    for dh in range(3):
        for dw in range(3):
            win = xp[:, :, dh:dh + H, dw:dw + W]
            out = out + jnp.einsum("oi,nihw->nohw", w9[dh * 3 + dw], win)
    return out + b.reshape(1, -1, 1, 1)


def _gn_silu_ref(x, gamma, beta):
    N, C, H, W = x.shape
    xg = x.reshape(N, NUM_GROUPS, -1)
    mean = xg.mean(axis=-1, keepdims=True)
    var = xg.var(axis=-1, keepdims=True)
    xn = ((xg - mean) * jax.lax.rsqrt(var + EPS)).reshape(N, C, H, W)
    y = xn * gamma.reshape(1, C, 1, 1) + beta.reshape(1, C, 1, 1)
    return y * jax.nn.sigmoid(y)


def lem_forward_ref(params, noisy_latents, timesteps):
    f32 = lambda a: a.astype(jnp.float32)
    temb = sinusoidal_embedding(timesteps, T_SIN)
    temb = jax.nn.silu(temb @ params["time_w1"] + params["time_b1"])
    temb = temb @ params["time_w2"] + params["time_b2"]
    temb_act = jax.nn.silu(temb)

    h = _conv3x3_ref(noisy_latents, f32(params["conv_in_w"]), params["conv_in_b"])
    for b in range(N_RESBLOCKS):
        skip = h
        g1 = _gn_silu_ref(h, params["rb_gn1_g"][b], params["rb_gn1_b"][b])
        tproj = temb_act @ params["rb_temb_w"][b] + params["rb_temb_b"][b]
        h1 = _conv3x3_ref(g1, f32(params["rb_conv1_w"][b]), params["rb_conv1_b"][b])
        h1 = h1 + tproj[:, :, None, None]
        g2 = _gn_silu_ref(h1, params["rb_gn2_g"][b], params["rb_gn2_b"][b])
        h = _conv3x3_ref(g2, f32(params["rb_conv2_w"][b]), params["rb_conv2_b"][b]) + skip
    go = _gn_silu_ref(h, params["gn_out_g"], params["gn_out_b"])
    return _conv3x3_ref(go, f32(params["conv_out_w"]), params["conv_out_b"])


# ------------------------------------ main ------------------------------------
if __name__ == "__main__":
    key = jax.random.PRNGKey(0)
    k_param, k_lat, k_t = jax.random.split(key, 3)

    params = init_params(k_param)
    noisy_latents = jax.random.normal(k_lat, (2, C_IN, 16, 16), dtype=jnp.float32)  # NCHW
    timesteps = jax.random.randint(k_t, (2,), 0, 1000, dtype=jnp.int32)

    roll_matches_jnp = _probe_roll_direction()

    fwd = jax.jit(lem_forward, static_argnames=("roll_matches_jnp", "batches_per_step"))
    noise_pred = fwd(params, noisy_latents, timesteps,
                     roll_matches_jnp=roll_matches_jnp)
    noise_pred = jax.block_until_ready(noise_pred)

    assert noise_pred.shape == (2, C_OUT, 16, 16)
    assert bool(jnp.all(jnp.isfinite(noise_pred)))

    # correctness vs. pure-JAX reference (bf16 weights/activations in the conv
    # dots, f32 elsewhere -> loose tolerance)
    ref = lem_forward_ref(params, noisy_latents, timesteps)
    max_err = float(jnp.max(jnp.abs(noise_pred - ref)))
    assert max_err < 5e-2, f"kernel/reference mismatch: max|diff|={max_err}"

    print("KERNEL_OK")
</pallas_src>

<mosaic_0001>
module attributes {stable_mosaic.version = 11 : i64} {
  func.func @k(%arg0: memref<8x128xf32, #tpu.memory_space<vmem>>, %arg1: memref<8x128xf32, #tpu.memory_space<vmem>>) attributes {dimension_semantics = [], scalar_prefetch = 0 : i64, scratch_operands = 0 : i64, tpu.core_type = #tpu.core_type<tc>} {
    %c0 = arith.constant 0 : index
    %c0_0 = arith.constant 0 : index
    %0 = vector.load %arg0[%c0, %c0_0] : memref<8x128xf32, #tpu.memory_space<vmem>>, vector<8x128xf32>
    %c1_i32 = arith.constant 1 : i32
    %1 = tpu.dynamic_rotate %0 by %c1_i32 dim 1 : vector<8x128xf32>, i32 -> vector<8x128xf32>
    %c0_1 = arith.constant 0 : index
    %c0_2 = arith.constant 0 : index
    %2 = vector.load %arg1[%c0_1, %c0_2] : memref<8x128xf32, #tpu.memory_space<vmem>>, vector<8x128xf32>
    tpu.vector_store %arg1[%c0_1, %c0_2], %1 {strides = array<i32>} : memref<8x128xf32, #tpu.memory_space<vmem>>, vector<8x128xf32>,
    return
  }
}

</mosaic_0001>

<bundles_post_ra>
// kernel: tpu_custom_call.1
= control target key start
LH: loop header
LB: loop body
LE: loop exit
PB: predicated region body
PF: predicated region fallthrough
CT: control target
= control target key end

     0   :  { %6 = vsyncpa [#allocation3], 0  ;;  %s118_s0 = inlined_call_operand.hbm [shape: f32[8,128], index: 0, kind: input, shape index: {}]   ;;  %s119_s1 = inlined_call_operand.hbm [shape: f32[8,128], index: 1, kind: output, shape index: {}]  }
   0x1   :  { %7 = vsyncpa [#allocation4], 0  ;;  %s13_s8 = sshll.u32 %s118_s0, 4  ;;  %s99_s9 = smov [#allocation2]   ;;  %s14_s8 = int_to_ptr.hbm [resolvable:$true] %s13_s8 }
   0x2   :  { %s15_s10 = sshll.u32 %s99_s9, 4  ;;  %s16_s10 = int_to_ptr.vmem [resolvable:$true] %s15_s10 }
   0x3   :  { %18 = dma.hbm_to_vmem [thread:$0]  %s14_s8, 128, %s16_s10, [#allocation3]  }
   0x4   :  { %95 = dma.done.wait [#allocation3], 128  }
   0x5   :  { %96 = vsyncadd [#allocation3], 4294967168  ;;  %v23_v0 = vld [vmem:[#allocation2] sm:$0xff]  ;;  %s100_s11 = smov 1   ;;  %s101_s12 = smov [#allocation5]  }
   0x6   :  { %24 = vrot.lane.b32.xlu0 %v23_v0, %s100_s11  ;;  %s32_s13 = sshll.u32 %s101_s12, 4  ;;  %s34_s16 = sshll.u32 %s119_s1, 4  ;;  %s33_s13 = int_to_ptr.vmem [resolvable:$true] %s32_s13  ;;  %s35_s16 = int_to_ptr.hbm [resolvable:$true] %s34_s16 }
  0x78   :  { %v25_v1 = vpop.permute.xlu0 %24 }
  0x79   :  { %26 = vst [vmem:[#allocation5] sm:$0xff] %v25_v1 }
  0x7a   :  { %37 = dma.vmem_to_hbm [thread:$0]  %s33_s13, 128, %s35_s16, [#allocation4]  }
  0x7b   :  { %97 = dma.done.wait [#allocation4], 128  }
  0x7c   :  { %98 = vsyncadd [#allocation4], 4294967168 }
  0x7d   :  { %42 = vsyncpa [#allocation3], 1 }
  0x7e   :  { %43 = vsyncpa [#allocation4], 1 }

</bundles_post_ra>
